<compile_context>
chip_gen: v7x
topology: tpu7x:2x2x1
jax: 0.10.0
libtpu: 0.0.40
codegen_flags: <defaults>
</compile_context>

<pallas_src>
import functools

import jax
import jax.numpy as jnp
from jax.experimental import pallas as pl
from jax.experimental.pallas import tpu as pltpu


def _linear_net1_kernel(xT_ref, w1c0_ref, w1c1_ref, b1_ref, w2d_ref, b2d_ref, o_ref):
    x0 = xT_ref[0:1, :]                                 # (1, TB)  batch on lanes
    x1 = xT_ref[1:2, :]                                 # (1, TB)

    # Linear(2, num) + ReLU: two VPU FMAs seeded with the lane-broadcast bias.
    h = b1_ref[...] + w1c0_ref[...] * x0                # (num, TB)
    h = h + w1c1_ref[...] * x1
    h = jnp.maximum(h, 0.0)

    # Layer 2 collapsed to the logit difference:
    #   d = (w2[0] - w2[1]) @ h + (b2[0] - b2[1])        -> single f32 MXU row
    d = jnp.dot(w2d_ref[...], h, preferred_element_type=jnp.float32) + b2d_ref[...]

    # softmax over 2 classes == sigmoid of the logit difference:
    #   p1 = 1 / (1 + exp(l0 - l1)),  p0 = 1 - p1  (rows sum to 1 by construction)
    d = jnp.minimum(d, 80.0)                            # avoid f32 overflow in exp
    p1 = 1.0 / (1.0 + jnp.exp(d))                       # (1, TB)
    o_ref[0:1, :] = 1.0 - p1                            # two lane-dense row stores,
    o_ref[1:2, :] = p1                                  # no (2, TB) concat temp


def _pick_tb(B, num, tb=None):
    """Largest lane-aligned batch tile within a conservative VMEM budget."""
    if tb is None:
        # The (num, tb) f32 hidden block (plus a few compiler temps) dominates
        # VMEM use; a 16 MiB budget keeps the tile safe on v7x's smaller VMEM.
        budget = 16 * 1024 * 1024
        per_lane = 4 * num * 4 + 2 * 2 * (2 * 4)        # ~4 hidden temps + dbl-buffered io
        tb = min(16384, budget // per_lane)
    tb = max(128, (tb // 128) * 128)
    # Never over-pad tiny batches; keep >=2 grid steps once B > 256 so the
    # "parallel" grid axis gives both v7x TensorCores work.
    half = pl.cdiv(B, 2) if B > 256 else B
    tb = min(tb, 128 * pl.cdiv(half, 128))
    return int(tb)


def _forward_t_core(xT, w1, b1, w2, b2, tb):
    """xT: (2, B) f32 -> (2, B) f32 softmax probabilities (batch on lanes)."""
    num = w1.shape[0]
    B = xT.shape[1]
    B_pad = tb * pl.cdiv(B, tb)
    if B_pad != B:
        xT = jnp.pad(xT, ((0, 0), (0, B_pad - B)))

    # Pre-fold the 2-class head into one logit-difference row (tiny, runs under jit).
    w1c0 = w1[:, 0:1]                                   # (num, 1)
    w1c1 = w1[:, 1:2]                                   # (num, 1)
    b1c = b1.reshape(num, 1)                            # (num, 1)
    w2d = w2[0:1, :] - w2[1:2, :]                       # (1, num)
    b2d = (b2[0] - b2[1]).reshape(1, 1)                 # (1, 1)

    out = pl.pallas_call(
        _linear_net1_kernel,
        out_shape=jax.ShapeDtypeStruct((2, B_pad), jnp.float32),
        grid_spec=pltpu.PrefetchScalarGridSpec(
            num_scalar_prefetch=0,
            grid=(B_pad // tb,),
            in_specs=[
                pl.BlockSpec((2, tb), lambda i: (0, i)),     # x tile (batch on lanes)
                pl.BlockSpec((num, 1), lambda i: (0, 0)),    # w1[:, 0]   (resident)
                pl.BlockSpec((num, 1), lambda i: (0, 0)),    # w1[:, 1]   (resident)
                pl.BlockSpec((num, 1), lambda i: (0, 0)),    # b1         (resident)
                pl.BlockSpec((1, num), lambda i: (0, 0)),    # w2[0]-w2[1]
                pl.BlockSpec((1, 1), lambda i: (0, 0)),      # b2[0]-b2[1]
            ],
            out_specs=pl.BlockSpec((2, tb), lambda i: (0, i)),
        ),
        compiler_params=pltpu.CompilerParams(
            dimension_semantics=("parallel",),    # v7x: shard batch tiles across both TCs
            vmem_limit_bytes=48 * 1024 * 1024,    # actual use stays well below budget
        ),
    )(xT, w1c0, w1c1, b1c, w2d, b2d)

    return out[:, :B] if B_pad != B else out


@functools.partial(jax.jit, static_argnames=("tb",))
def _forward_t_jit(xT, w1, b1, w2, b2, *, tb):
    return _forward_t_core(xT, w1, b1, w2, b2, tb)


@functools.partial(jax.jit, static_argnames=("tb",))
def _forward_jit(x, w1, b1, w2, b2, *, tb):
    # PyTorch-native (B, 2) layout: transpose in/out, but fused under a single jit.
    return _forward_t_core(x.T, w1, b1, w2, b2, tb).T


def linear_net1_forward_t(xT, params, *, tb=None):
    """Preferred API: xT is (2, B) f32 (batch on lanes); returns (2, B) probs."""
    w1, b1, w2, b2 = params
    tb = _pick_tb(xT.shape[1], w1.shape[0], tb)
    return _forward_t_jit(xT, w1, b1, w2, b2, tb=tb)


def linear_net1_forward(x, params, *, tb=None):
    """PyTorch-layout API: x is (B, 2) f32; returns (B, 2) softmax probabilities."""
    w1, b1, w2, b2 = params
    tb = _pick_tb(x.shape[0], w1.shape[0], tb)
    return _forward_jit(x, w1, b1, w2, b2, tb=tb)


def init_params(key, num):
    """PyTorch-default-like init, PyTorch-native layouts: W [out, in], b [out]."""
    ks = jax.random.split(key, 4)

    def lin(kw, kb, fan_in, fan_out):
        bound = 1.0 / (fan_in ** 0.5)
        w = jax.random.uniform(kw, (fan_out, fan_in), jnp.float32, -bound, bound)
        b = jax.random.uniform(kb, (fan_out,), jnp.float32, -bound, bound)
        return w, b

    w1, b1 = lin(ks[0], ks[1], 2, num)
    w2, b2 = lin(ks[2], ks[3], num, 2)
    return (w1, b1, w2, b2)


def reference_forward(x, params):
    """Pure-JAX f32 reference matching the PyTorch module."""
    w1, b1, w2, b2 = params
    h = jnp.maximum(x @ w1.T + b1, 0.0)
    return jax.nn.softmax(h @ w2.T + b2, axis=1)


if __name__ == "__main__":
    key = jax.random.PRNGKey(0)
    k_x, k_p, k_x2 = jax.random.split(key, 3)

    num = 32        # hidden width ("num" arg of LinearNet1)
    batch = 8
    params = init_params(k_p, num)

    # PyTorch-layout path: (B, 2) in / (B, 2) out.
    x = jax.random.normal(k_x, (batch, 2), dtype=jnp.float32)
    out = jax.block_until_ready(linear_net1_forward(x, params))
    ref = reference_forward(x, params)
    assert out.shape == (batch, 2)
    assert bool(jnp.allclose(jnp.sum(out, axis=1), 1.0, atol=1e-6))
    assert bool(jnp.allclose(out, ref, atol=1e-5)), float(jnp.max(jnp.abs(out - ref)))

    # Lane-dense (2, B) path, exercising padding and a multi-tile grid.
    batch2 = 300
    x2 = jax.random.normal(k_x2, (batch2, 2), dtype=jnp.float32)
    out2_t = jax.block_until_ready(linear_net1_forward_t(x2.T, params))
    ref2 = reference_forward(x2, params)
    assert out2_t.shape == (2, batch2)
    assert bool(jnp.allclose(out2_t.T, ref2, atol=1e-5))

    print("KERNEL_OK")
</pallas_src>

<mosaic_0001>
module attributes {stable_mosaic.version = 11 : i64} {
  func.func @_linear_net1_kernel(%arg0: i32, %arg1: memref<2x128xf32, #tpu.memory_space<vmem>>, %arg2: memref<32x1xf32, #tpu.memory_space<vmem>>, %arg3: memref<32x1xf32, #tpu.memory_space<vmem>>, %arg4: memref<32x1xf32, #tpu.memory_space<vmem>>, %arg5: memref<1x32xf32, #tpu.memory_space<vmem>>, %arg6: memref<1x1xf32, #tpu.memory_space<vmem>>, %arg7: memref<2x128xf32, #tpu.memory_space<vmem>>) attributes {dimension_semantics = [#tpu.dimension_semantics<parallel>], iteration_bounds = array<i64: 1>, scalar_prefetch = 0 : i64, scratch_operands = 0 : i64, tpu.core_type = #tpu.core_type<tc>, window_params = [{transform_indices = @transform_0, window_bounds = array<i64: 2, 128>}, {pipeline_mode = #tpu.pipeline_mode<synchronous>, transform_indices = @transform_1, window_bounds = array<i64: 32, 1>}, {pipeline_mode = #tpu.pipeline_mode<synchronous>, transform_indices = @transform_2, window_bounds = array<i64: 32, 1>}, {pipeline_mode = #tpu.pipeline_mode<synchronous>, transform_indices = @transform_3, window_bounds = array<i64: 32, 1>}, {pipeline_mode = #tpu.pipeline_mode<synchronous>, transform_indices = @transform_4, window_bounds = array<i64: 1, 32>}, {pipeline_mode = #tpu.pipeline_mode<synchronous>, transform_indices = @transform_5, window_bounds = array<i64: 1, 1>}, {transform_indices = @transform_6, window_bounds = array<i64: 2, 128>}]} {
    %c0 = arith.constant 0 : index
    %c0_0 = arith.constant 0 : index
    %0 = vector.load %arg1[%c0, %c0_0] : memref<2x128xf32, #tpu.memory_space<vmem>>, vector<1x128xf32>
    %c1 = arith.constant 1 : index
    %c0_1 = arith.constant 0 : index
    %1 = vector.load %arg1[%c1, %c0_1] : memref<2x128xf32, #tpu.memory_space<vmem>>, vector<1x128xf32>
    %c0_2 = arith.constant 0 : index
    %c0_3 = arith.constant 0 : index
    %2 = vector.load %arg4[%c0_2, %c0_3] : memref<32x1xf32, #tpu.memory_space<vmem>>, vector<32x1xf32>
    %c0_4 = arith.constant 0 : index
    %c0_5 = arith.constant 0 : index
    %3 = vector.load %arg2[%c0_4, %c0_5] : memref<32x1xf32, #tpu.memory_space<vmem>>, vector<32x1xf32>
    %4 = vector.broadcast %3 : vector<32x1xf32> to vector<32x128xf32>
    %5 = vector.broadcast %0 : vector<1x128xf32> to vector<32x128xf32>
    %6 = arith.mulf %4, %5 : vector<32x128xf32>
    %7 = vector.broadcast %2 : vector<32x1xf32> to vector<32x128xf32>
    %8 = arith.addf %7, %6 : vector<32x128xf32>
    %c0_6 = arith.constant 0 : index
    %c0_7 = arith.constant 0 : index
    %9 = vector.load %arg3[%c0_6, %c0_7] : memref<32x1xf32, #tpu.memory_space<vmem>>, vector<32x1xf32>
    %10 = vector.broadcast %9 : vector<32x1xf32> to vector<32x128xf32>
    %11 = vector.broadcast %1 : vector<1x128xf32> to vector<32x128xf32>
    %12 = arith.mulf %10, %11 : vector<32x128xf32>
    %13 = arith.addf %8, %12 : vector<32x128xf32>
    %cst = arith.constant 0.000000e+00 : f32
    %14 = vector.broadcast %cst : f32 to vector<32x128xf32>
    %15 = arith.maximumf %13, %14 : vector<32x128xf32>
    %c0_8 = arith.constant 0 : index
    %c0_9 = arith.constant 0 : index
    %16 = vector.load %arg5[%c0_8, %c0_9] : memref<1x32xf32, #tpu.memory_space<vmem>>, vector<1x32xf32>
    %cst_10 = arith.constant dense<0.000000e+00> : vector<1x128xf32>
    %17 = tpu.matmul %16, %15, %cst_10 {dimension_numbers = #tpu.dot_dimension_numbers<[1], [0], [0], [1], [0, 0, 1, 1], [], []>} : vector<1x32xf32>, vector<32x128xf32>, vector<1x128xf32> -> vector<1x128xf32>
    %c0_11 = arith.constant 0 : index
    %c0_12 = arith.constant 0 : index
    %18 = vector.load %arg6[%c0_11, %c0_12] : memref<1x1xf32, #tpu.memory_space<vmem>>, vector<1x1xf32>
    %19 = vector.broadcast %18 : vector<1x1xf32> to vector<1x128xf32>
    %20 = arith.addf %17, %19 : vector<1x128xf32>
    %cst_13 = arith.constant 8.000000e+01 : f32
    %21 = vector.broadcast %cst_13 : f32 to vector<1x128xf32>
    %22 = arith.minimumf %20, %21 : vector<1x128xf32>
    %23 = math.exp %22 : vector<1x128xf32>
    %cst_14 = arith.constant 1.000000e+00 : f32
    %24 = vector.broadcast %cst_14 : f32 to vector<1x128xf32>
    %25 = arith.addf %24, %23 : vector<1x128xf32>
    %cst_15 = arith.constant 1.000000e+00 : f32
    %26 = vector.broadcast %cst_15 : f32 to vector<1x128xf32>
    %27 = arith.divf %26, %25 : vector<1x128xf32>
    %cst_16 = arith.constant 1.000000e+00 : f32
    %28 = vector.broadcast %cst_16 : f32 to vector<1x128xf32>
    %29 = arith.subf %28, %27 : vector<1x128xf32>
    %c0_17 = arith.constant 0 : index
    %c0_18 = arith.constant 0 : index
    %30 = vector.load %arg7[%c0_17, %c0_18] : memref<2x128xf32, #tpu.memory_space<vmem>>, vector<1x128xf32>
    tpu.vector_store %arg7[%c0_17, %c0_18], %29 {strides = array<i32>} : memref<2x128xf32, #tpu.memory_space<vmem>>, vector<1x128xf32>,
    %c1_19 = arith.constant 1 : index
    %c0_20 = arith.constant 0 : index
    %31 = vector.load %arg7[%c1_19, %c0_20] : memref<2x128xf32, #tpu.memory_space<vmem>>, vector<1x128xf32>
    tpu.vector_store %arg7[%c1_19, %c0_20], %27 {strides = array<i32>} : memref<2x128xf32, #tpu.memory_space<vmem>>, vector<1x128xf32>,
    return
  }
  func.func @transform_0(%arg0: i32) -> (i32, i32) {
    %c0_i32 = arith.constant 0 : i32
    %c0_i32_0 = arith.constant 0 : i32
    return %c0_i32, %arg0 : i32, i32
  }
  func.func @transform_1(%arg0: i32) -> (i32, i32) {
    %c0_i32 = arith.constant 0 : i32
    %c0_i32_0 = arith.constant 0 : i32
    %c0_i32_1 = arith.constant 0 : i32
    return %c0_i32, %c0_i32_0 : i32, i32
  }
  func.func @transform_2(%arg0: i32) -> (i32, i32) {
    %c0_i32 = arith.constant 0 : i32
    %c0_i32_0 = arith.constant 0 : i32
    %c0_i32_1 = arith.constant 0 : i32
    return %c0_i32, %c0_i32_0 : i32, i32
  }
  func.func @transform_3(%arg0: i32) -> (i32, i32) {
    %c0_i32 = arith.constant 0 : i32
    %c0_i32_0 = arith.constant 0 : i32
    %c0_i32_1 = arith.constant 0 : i32
    return %c0_i32, %c0_i32_0 : i32, i32
  }
  func.func @transform_4(%arg0: i32) -> (i32, i32) {
    %c0_i32 = arith.constant 0 : i32
    %c0_i32_0 = arith.constant 0 : i32
    %c0_i32_1 = arith.constant 0 : i32
    return %c0_i32, %c0_i32_0 : i32, i32
  }
  func.func @transform_5(%arg0: i32) -> (i32, i32) {
    %c0_i32 = arith.constant 0 : i32
    %c0_i32_0 = arith.constant 0 : i32
    %c0_i32_1 = arith.constant 0 : i32
    return %c0_i32, %c0_i32_0 : i32, i32
  }
  func.func @transform_6(%arg0: i32) -> (i32, i32) {
    %c0_i32 = arith.constant 0 : i32
    %c0_i32_0 = arith.constant 0 : i32
    return %c0_i32, %arg0 : i32, i32
  }
}

</mosaic_0001>

<bundles_post_ra>
// kernel: _forward_jit.1
= control target key start
LH: loop header
LB: loop body
LE: loop exit
PB: predicated region body
PF: predicated region fallthrough
CT: control target
= control target key end

     0   :  { %v260_v0 = vmov 0   ;;  %v261_v12 = vmov 0.0|0.0   ;;  %vm262_vm0 = vmmov 0   ;;  %v263_v16 = vmov 0.0   ;;  %s353_s3 = inlined_call_operand.vmem [shape: f32[32,1], index: 3, kind: input, shape index: {}]   ;;  %s354_s1 = inlined_call_operand.vmem [shape: f32[32,1], index: 1, kind: input, shape index: {}]   ;;  %s355_s5 = inlined_call_operand.<no memory space> [shape: f32[1,1], index: 5, kind: input, shape index: {}]   ;;  %s356_s2 = inlined_call_operand.vmem [shape: f32[32,1], index: 2, kind: input, shape index: {}]   ;;  %s357_s0 = inlined_call_operand.vmem [shape: f32[2,128], index: 0, kind: input, shape index: {}]   ;;  %s358_s4 = inlined_call_operand.vmem [shape: f32[1,32], index: 4, kind: input, shape index: {}]   ;;  %s359_s6 = inlined_call_operand.vmem [shape: f32[2,128], index: 6, kind: output, shape index: {}]  }
   0x1   :  { %255 = vset.pattern.permute.xlu1 %v260_v0  ;;  %254 = vset.pattern.permute.xlu0 %v260_v0  ;;  %v27_v1 = vld [vmem:[%s353_s3] sm:$0xff]  ;;  %v11_v3 = vstv %s355_s5  ;;  %v28_v4 = vld [vmem:[%s353_s3 + $0x8] sm:$0xff]  ;;  %v34_v8 = vld [vmem:[%s354_s1 + $0x18] sm:$0xff]  ;;  %vm138_vm1 = vcmask 261120   ;;  %v134_v54 = vlaneseq }
   0x2   :  { %v31_v2 = vld [vmem:[%s354_s1] sm:$0xff]  ;;  %65 = vperm.xlu1 %255, %v27_v1   ;;  %12 = vst [vmem:[#allocation2] sm:$0x1] %v11_v3  ;;  %v32_v5 = vld [vmem:[%s354_s1 + $0x8] sm:$0xff]  ;;  %v33_v9 = vld [vmem:[%s354_s1 + $0x10] sm:$0xff]  ;;  %244 = vmatprep.subr.bf16.mxu0 %v261_v12 }
   0x3   :  { %37 = vperm.xlu0 %254, %v31_v2   ;;  %v88_v6 = vld [vmem:[%s356_s2 + $0x8] sm:$0xff]  ;;  %v87_v7 = vld [vmem:[%s356_s2] sm:$0xff]  ;;  %v30_v10 = vld [vmem:[%s353_s3 + $0x18] sm:$0xff]  ;;  %241 = vmatprep.mubr.msk.f32.mxu0 %vm262_vm0, %v263_v16  ;;  %v135_v55 = vshrl.u32 %v134_v54, 7 }
   0x4   :  { %v29_v11 = vld [vmem:[%s353_s3 + $0x10] sm:$0xff]  ;;  %v90_v13 = vld [vmem:[%s356_s2 + $0x18] sm:$0xff]  ;;  %v225_v19 = vld [vmem:[%s357_s0] ss:$0 sm:$0xff] }
   0x5   :  { %v89_v14 = vld [vmem:[%s356_s2 + $0x10] sm:$0xff]  ;;  %v226_v24 = vld [vmem:[%s357_s0 + $0x1] ss:$0 sm:$0xff]  ;;  %v127_v53 = vld [vmem:[%s358_s4] sm:$0x1]  ;;  %v136_v56 = vsub.s32 0, %v135_v55 }
   0x6   :  { %70 = vperm.xlu1 %255, %v28_v4  }
   0x7   :  { %42 = vperm.xlu0 %254, %v32_v5  }
   0x9   :  { %v128_v15 = vld [vmem:[#allocation2] sm:$0x1] }
   0xa   :  { %98 = vperm.xlu1 %255, %v88_v6  }
   0xb   :  { %93 = vperm.xlu0 %254, %v87_v7  }
   0xe   :  { %52 = vperm.xlu1 %255, %v34_v8  }
   0xf   :  { %47 = vperm.xlu0 %254, %v33_v9  }
  0x12   :  { %80 = vperm.xlu1 %255, %v30_v10  }
  0x13   :  { %75 = vperm.xlu0 %254, %v29_v11  }
  0x16   :  { %108 = vperm.xlu1 %255, %v90_v13  }
  0x17   :  { %103 = vperm.xlu0 %254, %v89_v14  }
  0x1b   :  { %131 = vperm.xlu0 %254, %v128_v15  }
  0x81   :  { %v66_v17 = vpop.permute.xlu1 %65 }
  0x82   :  { %v38_v18 = vpop.permute.xlu0 %37 }
  0x83   :  { %v59_v22 = vmul.f32 %v225_v19, %v38_v18 }
  0x85   :  { %v71_v20 = vpop.permute.xlu1 %70  ;;  %v83_v27 = vadd.f32 %v66_v17, %v59_v22 }
  0x86   :  { %v43_v21 = vpop.permute.xlu0 %42 }
  0x87   :  { %v60_v23 = vmul.f32 %v225_v19, %v43_v21 }
  0x89   :  { %v99_v25 = vpop.permute.xlu1 %98  ;;  %v84_v28 = vadd.f32 %v71_v20, %v60_v23 }
  0x8a   :  { %v94_v26 = vpop.permute.xlu0 %93  ;;  %v116_v29 = vmul.f32 %v226_v24, %v99_v25 }
  0x8b   :  { %v115_v30 = vmul.f32 %v226_v24, %v94_v26 }
  0x8c   :  { %v120_v31 = vadd.f32 %v116_v29, %v84_v28 }
  0x8d   :  { %v119_v32 = vadd.f32 %v115_v30, %v83_v27  ;;  %v53_v33 = vpop.permute.xlu1 %52 }
  0x8e   :  { %v48_v34 = vpop.permute.xlu0 %47  ;;  %v124_v35 = vmax.f32 %v120_v31, 0.0  ;;  %v62_v40 = vmul.f32 %v225_v19, %v53_v33 }
  0x8f   :  { %v123_v36 = vmax.f32 %v119_v32, 0.0  ;;  %v61_v41 = vmul.f32 %v225_v19, %v48_v34 }
  0x91   :  { %v245_v37 = vpack.c.bf16 %v124_v35, %v123_v36  ;;  %v81_v38 = vpop.permute.xlu1 %80 }
  0x92   :  { %v76_v39 = vpop.permute.xlu0 %75  ;;  %v86_v44 = vadd.f32 %v81_v38, %v62_v40 }
  0x93   :  { %246 = vmatpush3.bf16.msra.mxu0 %v245_v37  ;;  %v85_v45 = vadd.f32 %v76_v39, %v61_v41 }
  0x94   :  { %247 = vmatprep.subr.bf16.mxu0 %v261_v12 }
  0x95   :  { %v109_v42 = vpop.permute.xlu1 %108 }
  0x96   :  { %v104_v43 = vpop.permute.xlu0 %103  ;;  %v118_v46 = vmul.f32 %v226_v24, %v109_v42 }
  0x97   :  { %v117_v47 = vmul.f32 %v226_v24, %v104_v43 }
  0x98   :  { %v122_v48 = vadd.f32 %v118_v46, %v86_v44 }
  0x99   :  { %v121_v49 = vadd.f32 %v117_v47, %v85_v45 }
  0x9a   :  { %v126_v50 = vmax.f32 %v122_v48, 0.0  ;;  %v132_v57 = vpop.permute.xlu0 %131 }
  0x9b   :  { %v125_v51 = vmax.f32 %v121_v49, 0.0  ;;  %v137_v58 = vrot.slane %v132_v57, %v136_v56 }
  0x9d   :  { %v248_v52 = vpack.c.bf16 %v126_v50, %v125_v51 }
  0x9f   :  { %249 = vmatpush3.bf16.msra.mxu0 %v248_v52 }
  0xa2   :  { %242 = vmatmul.mubr.msk.f32.vlgmr.msra.gmra.mrb[0].mxu0 %vm138_vm1, %v127_v53 }
 0x175   :  { %v208_v59 = vpop.f32.mrb[0].mxu0 }
 0x176   :  { %v209_v60 = vadd.f32 %v208_v59, %v137_v58  ;;  %v243_v61 = vpop.f32.mrb[1].mxu0 }
 0x178   :  { %v212_v62 = vmin.f32 %v209_v60, 80.0 }
 0x17a   :  { %v213_v63 = vmul.f32 1.442695, %v212_v62 }
 0x17c   :  { %256 = vpow2.f32 %v213_v63 }
 0x186   :  { %v257_v0 = vpop.eup %256 }
 0x187   :  { %v215_v1 = vadd.f32 1.0, %v257_v0 }
 0x189   :  { %258 = vrcp.f32 %v215_v1 }
 0x193   :  { %v259_v2 = vpop.eup %258 }
 0x194   :  { %v218_v3 = vsub.f32 1.0, %v259_v2  ;;  %220 = vst [vmem:[%s359_s6 + $0x1] sm:$0x1] %v259_v2 }
 0x196   :  { %219 = vst [vmem:[%s359_s6] sm:$0x1] %v218_v3 }

</bundles_post_ra>
